<compile_context>
chip_gen: v6e
topology: v6e:2x2x1
jax: 0.10.0
libtpu: 0.0.40
codegen_flags: <defaults>
</compile_context>

<pallas_src>
import jax
import jax.numpy as jnp
from jax.experimental import pallas as pl
from jax.experimental.pallas import tpu as pltpu

M = 32                # m (feature width out of the UNet), from "m32"
NUM_CLASSES = 20
BN_EPS = 1e-4         # scn.BatchNormReLU default eps


def _bnrelu_linear_kernel(x_ref, affine_ref, w_ref, b_ref, o_ref):
    # x_ref:      (tn, 32)  point-feature rows
    # affine_ref: (2, 32)   row 0 = folded BN scale, row 1 = folded BN shift
    # w_ref:      (32, 20)  W^T in bf16
    # b_ref:      (1, 20)   bias
    # o_ref:      (tn, 20)  logits
    x = x_ref[...]
    scale = affine_ref[0:1, :]
    shift = affine_ref[1:2, :]
    h = jnp.maximum(x * scale + shift, 0.0)                 # BatchNormReLU
    o_ref[...] = (
        jnp.dot(h.astype(jnp.bfloat16), w_ref[...],
                preferred_element_type=jnp.float32)
        + b_ref[...]
    )


def _round_up(a, b):
    return ((a + b - 1) // b) * b


def bnrelu_linear(x, gamma, beta, running_mean, running_var, weight, bias,
                  *, tn=16384, core_parallel=False):
    """x: (N, M) f32; weight: (NUM_CLASSES, M); returns (N, NUM_CLASSES) f32."""
    N, m = x.shape
    assert m == M

    # Row tile: sublane-aligned (multiple of 8), clamped so small N doesn't
    # allocate an oversized block.  N need NOT divide tn: the last grid step
    # gets a partial block (reads past the edge are discarded row-wise, writes
    # are masked by Pallas).
    tn = max(8, min(_round_up(tn, 8), _round_up(N, 8)))
    grid = pl.cdiv(N, tn)

    # Fold inference-form BN into a per-channel affine (tiny, resident in VMEM).
    scale = (gamma / jnp.sqrt(running_var + BN_EPS)).astype(jnp.float32)  # (M,)
    shift = (beta - running_mean * scale).astype(jnp.float32)             # (M,)
    affine = jnp.stack([scale, shift], axis=0)                            # (2, M)

    w_t = weight.T.astype(jnp.bfloat16)                                   # (M, 20)
    b = bias.reshape(1, NUM_CLASSES).astype(jnp.float32)                  # (1, 20)

    # VMEM budget: x and out blocks are lane-padded to 128 in VMEM (f32), each
    # double-buffered.  Leave margin for residents + compiler scratch.
    block_vmem = 2 * 2 * tn * 128 * 4
    vmem_limit = min(block_vmem + (8 << 20), 56 << 20)

    dim_sem = (pltpu.CORE_PARALLEL,) if core_parallel else ("parallel",)

    cost = pl.CostEstimate(
        flops=2 * N * M * NUM_CLASSES + 4 * N * M,
        transcendentals=0,
        bytes_accessed=N * M * 4 + N * NUM_CLASSES * 4,
    )

    return pl.pallas_call(
        _bnrelu_linear_kernel,
        out_shape=jax.ShapeDtypeStruct((N, NUM_CLASSES), jnp.float32),
        grid_spec=pltpu.PrefetchScalarGridSpec(
            num_scalar_prefetch=0,
            grid=(grid,),
            in_specs=[
                pl.BlockSpec((tn, M), lambda i: (i, 0)),                 # x tile
                pl.BlockSpec((2, M), lambda i: (0, 0)),                  # BN affine (resident)
                pl.BlockSpec((M, NUM_CLASSES), lambda i: (0, 0)),        # W^T (resident)
                pl.BlockSpec((1, NUM_CLASSES), lambda i: (0, 0)),        # bias (resident)
            ],
            out_specs=pl.BlockSpec((tn, NUM_CLASSES), lambda i: (i, 0)),
        ),
        compiler_params=pltpu.CompilerParams(
            dimension_semantics=dim_sem,
            vmem_limit_bytes=vmem_limit,
        ),
        cost_estimate=cost,
    )(x, affine, w_t, b)


def reference(x, gamma, beta, running_mean, running_var, weight, bias):
    # Mirrors the kernel math (folded affine, bf16 matmul with f32 accumulation)
    # so the comparison is tight and independent of XLA's default dot precision.
    scale = gamma / jnp.sqrt(running_var + BN_EPS)
    shift = beta - running_mean * scale
    h = jnp.maximum(x * scale + shift, 0.0)
    y = jnp.dot(h.astype(jnp.bfloat16), weight.T.astype(jnp.bfloat16),
                preferred_element_type=jnp.float32)
    return y + bias


if __name__ == "__main__":
    key = jax.random.PRNGKey(0)
    k_x, k_g, k_b, k_mu, k_var, k_w, k_lb = jax.random.split(key, 7)

    # Deterministic synthetic parameters (shapes per BatchNormReLU(m) + Linear(m, 20)).
    gamma = 1.0 + 0.1 * jax.random.normal(k_g, (M,), dtype=jnp.float32)
    beta = 0.1 * jax.random.normal(k_b, (M,), dtype=jnp.float32)
    running_mean = 0.1 * jax.random.normal(k_mu, (M,), dtype=jnp.float32)
    running_var = jnp.abs(1.0 + 0.1 * jax.random.normal(k_var, (M,), dtype=jnp.float32))
    weight = jax.random.normal(k_w, (NUM_CLASSES, M), dtype=jnp.float32) * (1.0 / M**0.5)
    bias = 0.01 * jax.random.normal(k_lb, (NUM_CLASSES,), dtype=jnp.float32)

    # Case 1: tile-aligned single block.  Case 2: multi-block grid with a
    # ragged tail (1000 = 3*256 + 232) exercising the masked boundary block.
    for n_points, tile in ((128, 16384), (1000, 256)):
        x = jax.random.normal(k_x, (n_points, M), dtype=jnp.float32)
        out = bnrelu_linear(x, gamma, beta, running_mean, running_var,
                            weight, bias, tn=tile)
        out = jax.block_until_ready(out)

        ref = reference(x, gamma, beta, running_mean, running_var, weight, bias)
        assert out.shape == (n_points, NUM_CLASSES)
        assert jnp.allclose(out, ref, atol=1e-2, rtol=1e-2)

    print("KERNEL_OK")
</pallas_src>

<mosaic_0001>
module attributes {stable_mosaic.version = 11 : i64} {
  func.func @_bnrelu_linear_kernel(%arg0: i32, %arg1: memref<128x32xf32, #tpu.memory_space<vmem>>, %arg2: memref<2x32xf32, #tpu.memory_space<vmem>>, %arg3: memref<32x20xbf16, #tpu.memory_space<vmem>>, %arg4: memref<1x20xf32, #tpu.memory_space<vmem>>, %arg5: memref<128x20xf32, #tpu.memory_space<vmem>>) attributes {dimension_semantics = [#tpu.dimension_semantics<parallel>], iteration_bounds = array<i64: 1>, scalar_prefetch = 0 : i64, scratch_operands = 0 : i64, tpu.core_type = #tpu.core_type<tc>, window_params = [{transform_indices = @transform_0, window_bounds = array<i64: 128, 32>}, {pipeline_mode = #tpu.pipeline_mode<synchronous>, transform_indices = @transform_1, window_bounds = array<i64: 2, 32>}, {pipeline_mode = #tpu.pipeline_mode<synchronous>, transform_indices = @transform_2, window_bounds = array<i64: 32, 20>}, {pipeline_mode = #tpu.pipeline_mode<synchronous>, transform_indices = @transform_3, window_bounds = array<i64: 1, 20>}, {transform_indices = @transform_4, window_bounds = array<i64: 128, 20>}]} {
    %c0 = arith.constant 0 : index
    %c0_0 = arith.constant 0 : index
    %0 = vector.load %arg1[%c0, %c0_0] : memref<128x32xf32, #tpu.memory_space<vmem>>, vector<128x32xf32>
    %c0_1 = arith.constant 0 : index
    %c0_2 = arith.constant 0 : index
    %1 = vector.load %arg2[%c0_1, %c0_2] : memref<2x32xf32, #tpu.memory_space<vmem>>, vector<1x32xf32>
    %c1 = arith.constant 1 : index
    %c0_3 = arith.constant 0 : index
    %2 = vector.load %arg2[%c1, %c0_3] : memref<2x32xf32, #tpu.memory_space<vmem>>, vector<1x32xf32>
    %3 = vector.broadcast %1 : vector<1x32xf32> to vector<128x32xf32>
    %4 = arith.mulf %0, %3 : vector<128x32xf32>
    %5 = vector.broadcast %2 : vector<1x32xf32> to vector<128x32xf32>
    %6 = arith.addf %4, %5 : vector<128x32xf32>
    %cst = arith.constant 0.000000e+00 : f32
    %7 = vector.broadcast %cst : f32 to vector<128x32xf32>
    %8 = arith.maximumf %6, %7 : vector<128x32xf32>
    %9 = arith.truncf %8 : vector<128x32xf32> to vector<128x32xbf16>
    %c0_4 = arith.constant 0 : index
    %c0_5 = arith.constant 0 : index
    %10 = vector.load %arg3[%c0_4, %c0_5] : memref<32x20xbf16, #tpu.memory_space<vmem>>, vector<32x20xbf16>
    %cst_6 = arith.constant dense<0.000000e+00> : vector<128x20xf32>
    %11 = tpu.matmul %9, %10, %cst_6 {dimension_numbers = #tpu.dot_dimension_numbers<[1], [0], [0], [1], [0, 0, 1, 1], [], []>} : vector<128x32xbf16>, vector<32x20xbf16>, vector<128x20xf32> -> vector<128x20xf32>
    %c0_7 = arith.constant 0 : index
    %c0_8 = arith.constant 0 : index
    %12 = vector.load %arg4[%c0_7, %c0_8] : memref<1x20xf32, #tpu.memory_space<vmem>>, vector<1x20xf32>
    %13 = vector.broadcast %12 : vector<1x20xf32> to vector<128x20xf32>
    %14 = arith.addf %11, %13 : vector<128x20xf32>
    %c0_9 = arith.constant 0 : index
    %c0_10 = arith.constant 0 : index
    %15 = vector.load %arg5[%c0_9, %c0_10] : memref<128x20xf32, #tpu.memory_space<vmem>>, vector<128x20xf32>
    tpu.vector_store %arg5[%c0_9, %c0_10], %14 {strides = array<i32>} : memref<128x20xf32, #tpu.memory_space<vmem>>, vector<128x20xf32>,
    return
  }
  func.func @transform_0(%arg0: i32) -> (i32, i32) {
    %c0_i32 = arith.constant 0 : i32
    %c0_i32_0 = arith.constant 0 : i32
    return %arg0, %c0_i32 : i32, i32
  }
  func.func @transform_1(%arg0: i32) -> (i32, i32) {
    %c0_i32 = arith.constant 0 : i32
    %c0_i32_0 = arith.constant 0 : i32
    %c0_i32_1 = arith.constant 0 : i32
    return %c0_i32, %c0_i32_0 : i32, i32
  }
  func.func @transform_2(%arg0: i32) -> (i32, i32) {
    %c0_i32 = arith.constant 0 : i32
    %c0_i32_0 = arith.constant 0 : i32
    %c0_i32_1 = arith.constant 0 : i32
    return %c0_i32, %c0_i32_0 : i32, i32
  }
  func.func @transform_3(%arg0: i32) -> (i32, i32) {
    %c0_i32 = arith.constant 0 : i32
    %c0_i32_0 = arith.constant 0 : i32
    %c0_i32_1 = arith.constant 0 : i32
    return %c0_i32, %c0_i32_0 : i32, i32
  }
  func.func @transform_4(%arg0: i32) -> (i32, i32) {
    %c0_i32 = arith.constant 0 : i32
    %c0_i32_0 = arith.constant 0 : i32
    return %arg0, %c0_i32 : i32, i32
  }
}

</mosaic_0001>

<bundles_post_ra>
// kernel: tpu_custom_call.1
= control target key start
LH: loop header
LB: loop body
LE: loop exit
PB: predicated region body
PF: predicated region fallthrough
CT: control target
= control target key end

     0   :  { %vm123_vm0 = vcmask 261120   ;;  %vm245_vm1 = vcmask 162816   ;;  %s511_s2 = inlined_call_operand.vmem [shape: bf16[32,20], index: 2, kind: input, shape index: {}]   ;;  %s512_s0 = inlined_call_operand.vmem [shape: f32[128,32], index: 0, kind: input, shape index: {}]   ;;  %s513_s1 = inlined_call_operand.vmem [shape: f32[2,32], index: 1, kind: input, shape index: {}]   ;;  %s514_s3 = inlined_call_operand.vmem [shape: f32[1,20], index: 3, kind: input, shape index: {}]   ;;  %s515_s4 = inlined_call_operand.vmem [shape: f32[128,20], index: 4, kind: output, shape index: {}]  }
   0x1   :  { %v313_v0 = vld [vmem:[%s511_s2 + $0x8] sm:$0xff]   ;;  %v314_v1 = vld [vmem:[%s511_s2] sm:$0xff]   ;;  %v20_v12 = vld [vmem:[%s512_s0 + $0x10] sm:$0xff] }
   0x2   :  { %289 = vmatprep.subr.bf16.mxu0 %v313_v0  ;;  %309 = vmatprep.subr.bf16.mxu1 %v313_v0  ;;  %v18_v2 = vld [vmem:[%s512_s0] sm:$0xff]  ;;  %v19_v3 = vld [vmem:[%s512_s0 + $0x8] sm:$0xff]  ;;  %v21_v13 = vld [vmem:[%s512_s0 + $0x18] sm:$0xff] }
   0x3   :  { %v355_v4 = vld [vmem:[%s513_s1] ss:$0 sm:$0xff]  ;;  %290 = vmatpush3.bf16.msra.mxu0 %v313_v0  ;;  %311 = vmatpush3.bf16.msra.mxu1 %v313_v0  ;;  %v360_v5 = vld [vmem:[%s513_s1 + $0x1] ss:$0 sm:$0xff]  ;;  %v27_v9 = vld [vmem:[%s512_s0 + $0x48] sm:$0xff] }
   0x4   :  { %v40_v6 = vmul.f32 %v355_v4, %v18_v2  ;;  %v41_v7 = vmul.f32 %v355_v4, %v19_v3  ;;  %v26_v8 = vld [vmem:[%s512_s0 + $0x40] sm:$0xff]  ;;  %291 = vmatprep.subr.bf16.mxu0 %v314_v1  ;;  %310 = vmatprep.subr.bf16.mxu1 %v314_v1  ;;  %v49_v11 = vmul.f32 %v355_v4, %v27_v9  ;;  %v28_v14 = vld [vmem:[%s512_s0 + $0x50] sm:$0xff]  ;;  %v29_v19 = vld [vmem:[%s512_s0 + $0x58] sm:$0xff] }
   0x5   :  { %v48_v10 = vmul.f32 %v355_v4, %v26_v8  ;;  %v42_v17 = vmul.f32 %v355_v4, %v20_v12  ;;  %v43_v18 = vmul.f32 %v355_v4, %v21_v13  ;;  %v50_v22 = vmul.f32 %v355_v4, %v28_v14  ;;  %v22_v24 = vld [vmem:[%s512_s0 + $0x20] sm:$0xff]  ;;  %v23_v29 = vld [vmem:[%s512_s0 + $0x28] sm:$0xff]  ;;  %v24_v40 = vld [vmem:[%s512_s0 + $0x30] sm:$0xff] }
   0x6   :  { %v60_v15 = vadd.f32 %v360_v5, %v40_v6  ;;  %v61_v16 = vadd.f32 %v360_v5, %v41_v7  ;;  %v69_v21 = vadd.f32 %v360_v5, %v49_v11  ;;  %v51_v23 = vmul.f32 %v355_v4, %v29_v19  ;;  %v30_v34 = vld [vmem:[%s512_s0 + $0x60] sm:$0xff]  ;;  %v31_v35 = vld [vmem:[%s512_s0 + $0x68] sm:$0xff]  ;;  %v25_v41 = vld [vmem:[%s512_s0 + $0x38] sm:$0xff] }
   0x7   :  { %v68_v20 = vadd.f32 %v360_v5, %v48_v10  ;;  %292 = vmatpush3.bf16.msra.mxu0 %v314_v1  ;;  %312 = vmatpush3.bf16.msra.mxu1 %v314_v1  ;;  %v62_v27 = vadd.f32 %v360_v5, %v42_v17  ;;  %v63_v28 = vadd.f32 %v360_v5, %v43_v18  ;;  %v32_v46 = vld [vmem:[%s512_s0 + $0x70] sm:$0xff]  ;;  %v33_v51 = vld [vmem:[%s512_s0 + $0x78] sm:$0xff] }
   0x8   :  { %v76_v25 = vmax.f32 %v60_v15, 0.0  ;;  %v77_v26 = vmax.f32 %v61_v16, 0.0  ;;  %v85_v31 = vmax.f32 %v69_v21, 0.0  ;;  %v70_v32 = vadd.f32 %v360_v5, %v50_v22 }
   0x9   :  { %v84_v30 = vmax.f32 %v68_v20, 0.0  ;;  %v71_v33 = vadd.f32 %v360_v5, %v51_v23  ;;  %v78_v37 = vmax.f32 %v62_v27, 0.0  ;;  %v79_v38 = vmax.f32 %v63_v28, 0.0 }
   0xa   :  { %v92_v36 = vpack.c.bf16 %v77_v26, %v76_v25  ;;  %v44_v39 = vmul.f32 %v355_v4, %v22_v24  ;;  %v86_v43 = vmax.f32 %v70_v32, 0.0  ;;  %v45_v45 = vmul.f32 %v355_v4, %v23_v29 }
   0xb   :  { %v96_v42 = vpack.c.bf16 %v85_v31, %v84_v30  ;;  %v87_v44 = vmax.f32 %v71_v33, 0.0  ;;  %v93_v47 = vpack.c.bf16 %v79_v38, %v78_v37  ;;  %v52_v49 = vmul.f32 %v355_v4, %v30_v34 }
   0xc   :  { %293 = vmatprep.mubr.msk.bf16.mxu0 %vm123_vm0, %v92_v36  ;;  %v64_v48 = vadd.f32 %v360_v5, %v44_v39  ;;  %v53_v50 = vmul.f32 %v355_v4, %v31_v35  ;;  %v65_v53 = vadd.f32 %v360_v5, %v45_v45  ;;  %v46_v54 = vmul.f32 %v355_v4, %v24_v40 }
   0xd   :  { %301 = vmatprep.mubr.msk.bf16.mxu1 %vm123_vm0, %v96_v42  ;;  %v97_v52 = vpack.c.bf16 %v87_v44, %v86_v43  ;;  %v47_v55 = vmul.f32 %v355_v4, %v25_v41  ;;  %294 = vmatmul.mubr.msk.bf16.vlgmr.msra.gmra.mxu0 %vm123_vm0, %v93_v47  ;;  %v72_v57 = vadd.f32 %v360_v5, %v52_v49 }
   0xe   :  { %v80_v56 = vmax.f32 %v64_v48, 0.0  ;;  %v73_v58 = vadd.f32 %v360_v5, %v53_v50  ;;  %v54_v59 = vmul.f32 %v355_v4, %v32_v46  ;;  %v81_v60 = vmax.f32 %v65_v53, 0.0 }
   0xf   :  { %302 = vmatmul.mubr.msk.bf16.vlgmr.msra.gmra.mxu1 %vm123_vm0, %v97_v52  ;;  %v66_v61 = vadd.f32 %v360_v5, %v46_v54  ;;  %v67_v62 = vadd.f32 %v360_v5, %v47_v55  ;;  %v55_v63 = vmul.f32 %v355_v4, %v33_v51  ;;  %v88_v0 = vmax.f32 %v72_v57, 0.0  ;;  %v268_v4 = vld [vmem:[%s514_s3] ss:$0 sm:$0xff] }
  0x10   :  { %v89_v1 = vmax.f32 %v73_v58, 0.0  ;;  %v74_v2 = vadd.f32 %v360_v5, %v54_v59  ;;  %v94_v3 = vpack.c.bf16 %v81_v60, %v80_v56 }
  0x11   :  { %v82_v6 = vmax.f32 %v66_v61, 0.0  ;;  %v83_v7 = vmax.f32 %v67_v62, 0.0  ;;  %v75_v8 = vadd.f32 %v360_v5, %v55_v63 }
  0x12   :  { %v98_v9 = vpack.c.bf16 %v89_v1, %v88_v0  ;;  %v90_v10 = vmax.f32 %v74_v2, 0.0  ;;  %297 = vmatprep.mubr.msk.bf16.mxu0 %vm123_vm0, %v94_v3 }
  0x13   :  { %v95_v11 = vpack.c.bf16 %v83_v7, %v82_v6  ;;  %v91_v12 = vmax.f32 %v75_v8, 0.0 }
  0x14   :  { %305 = vmatprep.mubr.msk.bf16.mxu1 %vm123_vm0, %v98_v9 }
  0x15   :  { %v99_v13 = vpack.c.bf16 %v91_v12, %v90_v10  ;;  %298 = vmatmul.mubr.msk.bf16.gmra.mxu0 %vm123_vm0, %v95_v11 }
  0x17   :  { %306 = vmatmul.mubr.msk.bf16.gmra.mxu1 %vm123_vm0, %v99_v13 }
  0xcd   :  { %v295_v14 = vpop.f32.mrf.mxu0 }
  0xce   :  { %v191_v5 = vadd.f32 %v295_v14, %v268_v4 }
  0xcf   :  { %v303_v15 = vpop.f32.mrf.mxu1  ;;  %v182_v17 = vpop.f32.mrf.mxu0 }
  0xd0   :  { %v223_v16 = vadd.f32 %v303_v15, %v268_v4  ;;  %248 = vst.msk [vmem:[%s515_s4 + $0x10] sm:$0xff] %vm245_vm1, %v191_v5  ;;  %v183_v18 = vadd.f32 %v268_v4, %v182_v17 }
  0xd1   :  { %v214_v19 = vpop.f32.mrf.mxu1  ;;  %v296_v21 = vpop.f32.mrf.mxu0 }
  0xd2   :  { %256 = vst.msk [vmem:[%s515_s4 + $0x50] sm:$0xff] %vm245_vm1, %v223_v16  ;;  %v215_v20 = vadd.f32 %v268_v4, %v214_v19  ;;  %246 = vst.msk [vmem:[%s515_s4] sm:$0xff] %vm245_vm1, %v183_v18  ;;  %v194_v22 = vadd.f32 %v296_v21, %v268_v4 }
  0xd3   :  { %v304_v23 = vpop.f32.mrf.mxu1  ;;  %v185_v25 = vpop.f32.mrf.mxu0 }
  0xd4   :  { %254 = vst.msk [vmem:[%s515_s4 + $0x40] sm:$0xff] %vm245_vm1, %v215_v20  ;;  %v226_v24 = vadd.f32 %v304_v23, %v268_v4  ;;  %249 = vst.msk [vmem:[%s515_s4 + $0x18] sm:$0xff] %vm245_vm1, %v194_v22  ;;  %v186_v26 = vadd.f32 %v268_v4, %v185_v25 }
  0xd5   :  { %v217_v27 = vpop.f32.mrf.mxu1  ;;  %v299_v29 = vpop.f32.mrf.mxu0 }
  0xd6   :  { %257 = vst.msk [vmem:[%s515_s4 + $0x58] sm:$0xff] %vm245_vm1, %v226_v24  ;;  %v218_v28 = vadd.f32 %v268_v4, %v217_v27  ;;  %247 = vst.msk [vmem:[%s515_s4 + $0x8] sm:$0xff] %vm245_vm1, %v186_v26  ;;  %v207_v30 = vadd.f32 %v299_v29, %v268_v4 }
  0xd7   :  { %v307_v31 = vpop.f32.mrf.mxu1  ;;  %v198_v33 = vpop.f32.mrf.mxu0 }
  0xd8   :  { %255 = vst.msk [vmem:[%s515_s4 + $0x48] sm:$0xff] %vm245_vm1, %v218_v28  ;;  %v239_v32 = vadd.f32 %v307_v31, %v268_v4  ;;  %252 = vst.msk [vmem:[%s515_s4 + $0x30] sm:$0xff] %vm245_vm1, %v207_v30  ;;  %v199_v34 = vadd.f32 %v268_v4, %v198_v33 }
  0xd9   :  { %v230_v35 = vpop.f32.mrf.mxu1  ;;  %v300_v37 = vpop.f32.mrf.mxu0 }
  0xda   :  { %260 = vst.msk [vmem:[%s515_s4 + $0x70] sm:$0xff] %vm245_vm1, %v239_v32  ;;  %v231_v36 = vadd.f32 %v268_v4, %v230_v35  ;;  %250 = vst.msk [vmem:[%s515_s4 + $0x20] sm:$0xff] %vm245_vm1, %v199_v34  ;;  %v210_v38 = vadd.f32 %v300_v37, %v268_v4 }
  0xdb   :  { %v308_v39 = vpop.f32.mrf.mxu1  ;;  %v201_v41 = vpop.f32.mrf.mxu0 }
  0xdc   :  { %258 = vst.msk [vmem:[%s515_s4 + $0x60] sm:$0xff] %vm245_vm1, %v231_v36  ;;  %v242_v40 = vadd.f32 %v308_v39, %v268_v4  ;;  %253 = vst.msk [vmem:[%s515_s4 + $0x38] sm:$0xff] %vm245_vm1, %v210_v38  ;;  %v202_v42 = vadd.f32 %v268_v4, %v201_v41 }
  0xdd   :  { %v233_v43 = vpop.f32.mrf.mxu1 }
  0xde   :  { %261 = vst.msk [vmem:[%s515_s4 + $0x78] sm:$0xff] %vm245_vm1, %v242_v40  ;;  %v234_v44 = vadd.f32 %v268_v4, %v233_v43  ;;  %251 = vst.msk [vmem:[%s515_s4 + $0x28] sm:$0xff] %vm245_vm1, %v202_v42 }
  0xe0   :  { %259 = vst.msk [vmem:[%s515_s4 + $0x68] sm:$0xff] %vm245_vm1, %v234_v44 }

</bundles_post_ra>
